<compile_context>
chip_gen: v6e
topology: v6e:2x2x1
jax: 0.10.0
libtpu: 0.0.40
codegen_flags: <defaults>
</compile_context>

<pallas_src>
import jax
import jax.numpy as jnp
from jax.experimental import pallas as pl
from jax.experimental.pallas import tpu as pltpu


def _round_up(x, m):
    return ((x + m - 1) // m) * m


def _onehot(ids, num_rows):
    """ids: (TQ, 1) int32 -> (TQ, num_rows) float32 one-hot."""
    iota = jax.lax.broadcasted_iota(jnp.int32, (ids.shape[0], num_rows), 1)
    return (ids == iota).astype(jnp.float32)


def _vad_embed_train_kernel(ids_ref, mu_ref, logvar_ref, eps_ref, out_ref):
    onehot = _onehot(ids_ref[...], mu_ref.shape[0])                     # (TQ, E)
    mu = jnp.dot(onehot, mu_ref[...].astype(jnp.float32),
                 preferred_element_type=jnp.float32)                    # (TQ, D)
    # Hoisted: std over the resident table (E*D exps), then gathered via the same matmul.
    std_table = jnp.exp(0.5 * logvar_ref[...].astype(jnp.float32))      # (E, D)
    std = jnp.dot(onehot, std_table, preferred_element_type=jnp.float32)
    out_ref[...] = (mu + eps_ref[...].astype(jnp.float32) * std).astype(out_ref.dtype)


def _vad_embed_eval_kernel(ids_ref, mu_ref, out_ref):
    onehot = _onehot(ids_ref[...], mu_ref.shape[0])                     # (TQ, E)
    out_ref[...] = jnp.dot(onehot, mu_ref[...].astype(jnp.float32),
                           preferred_element_type=jnp.float32).astype(out_ref.dtype)


def var_vad_embedding(weight_mu, weight_logvar, query_index, seed, train=True):
    """Pallas equivalent of VarVADEmbedding.forward(query_index, train)."""
    n_q = query_index.shape[0]
    emb_n, dim = weight_mu.shape

    # Pad the table row count to a sublane multiple (padded rows are never selected).
    emb_pad = _round_up(emb_n, 8)
    if emb_pad != emb_n:
        pad = ((0, emb_pad - emb_n), (0, 0))
        weight_mu = jnp.pad(weight_mu, pad)
        weight_logvar = jnp.pad(weight_logvar, pad)

    # Sublane-dense query tile (>= 8 rows), capped at 256 (MXU M dim on v6e/v7x).
    tq = min(256, _round_up(n_q, 8))
    n_pad = _round_up(n_q, tq)
    grid = (n_pad // tq,)

    # Padded query ids (pad with a valid index 0; padded rows are sliced off below).
    ids = jnp.zeros((n_pad, 1), jnp.int32).at[:n_q, 0].set(query_index.astype(jnp.int32))

    ids_spec = pl.BlockSpec((tq, 1), lambda i: (i, 0))
    table_spec = pl.BlockSpec((emb_pad, dim), lambda i: (0, 0))  # VMEM-resident table
    row_spec = pl.BlockSpec((tq, dim), lambda i: (i, 0))

    cp = pltpu.CompilerParams(dimension_semantics=("parallel",))
    out_shape = jax.ShapeDtypeStruct((n_pad, dim), weight_mu.dtype)

    if train:
        eps = jax.random.normal(jax.random.PRNGKey(seed), (n_pad, dim), jnp.float32)
        out = pl.pallas_call(
            _vad_embed_train_kernel,
            out_shape=out_shape,
            grid_spec=pltpu.PrefetchScalarGridSpec(
                num_scalar_prefetch=0,
                grid=grid,
                in_specs=[ids_spec, table_spec, table_spec, row_spec],
                out_specs=row_spec,
            ),
            compiler_params=cp,
        )(ids, weight_mu, weight_logvar, eps)
    else:
        # Eval: weight_logvar / eps are not inputs at all -> no wasted DMA traffic.
        out = pl.pallas_call(
            _vad_embed_eval_kernel,
            out_shape=out_shape,
            grid_spec=pltpu.PrefetchScalarGridSpec(
                num_scalar_prefetch=0,
                grid=grid,
                in_specs=[ids_spec, table_spec],
                out_specs=row_spec,
            ),
            compiler_params=cp,
        )(ids, weight_mu)

    return out[:n_q]


if __name__ == "__main__":
    # Small shapes consistent with the module (defaults are 256 dims / 90 rows).
    embedding_dims = 128
    embedding_nums = 24
    num_queries = 16

    key = jax.random.PRNGKey(0)
    k_mu, k_idx = jax.random.split(key)

    # Deterministic parameter init, matching reset_parameters():
    #   weight_mu ~ N(0, 1/sqrt(dim)),  weight_logvar = 0.001 (non-trainable)
    mu_init_std = 1.0 / jnp.sqrt(jnp.float32(embedding_dims))
    weight_mu = (jax.random.normal(k_mu, (embedding_nums, embedding_dims),
                                   dtype=jnp.float32) * mu_init_std)
    weight_logvar = jnp.full((embedding_nums, embedding_dims), 0.001, jnp.float32)

    query_index = jax.random.randint(k_idx, (num_queries,), 0, embedding_nums,
                                     dtype=jnp.int32)

    # train=True: gathered mu + Gaussian noise scaled by exp(0.5 * logvar)
    out_train = var_vad_embedding(weight_mu, weight_logvar, query_index,
                                  seed=1234, train=True)
    out_train = jax.block_until_ready(out_train)

    # train=False: plain embedding gather
    out_eval = var_vad_embedding(weight_mu, weight_logvar, query_index,
                                 seed=1234, train=False)
    out_eval = jax.block_until_ready(out_eval)

    # Sanity checks against the reference semantics.
    ref_gather = weight_mu[query_index]
    assert out_train.shape == (num_queries, embedding_dims)
    assert out_eval.shape == (num_queries, embedding_dims)
    assert bool(jnp.all(jnp.isfinite(out_train)))
    assert bool(jnp.allclose(out_eval, ref_gather, atol=1e-6))
    # Noise should actually perturb the embeddings in train mode.
    assert float(jnp.max(jnp.abs(out_train - ref_gather))) > 1e-3

    print("KERNEL_OK")
</pallas_src>

<mosaic_0001>
module attributes {stable_mosaic.version = 11 : i64} {
  func.func @_vad_embed_train_kernel(%arg0: i32, %arg1: memref<16x1xi32, #tpu.memory_space<vmem>>, %arg2: memref<24x128xf32, #tpu.memory_space<vmem>>, %arg3: memref<24x128xf32, #tpu.memory_space<vmem>>, %arg4: memref<16x128xf32, #tpu.memory_space<vmem>>, %arg5: memref<16x128xf32, #tpu.memory_space<vmem>>) attributes {dimension_semantics = [#tpu.dimension_semantics<parallel>], iteration_bounds = array<i64: 1>, scalar_prefetch = 0 : i64, scratch_operands = 0 : i64, tpu.core_type = #tpu.core_type<tc>, window_params = [{transform_indices = @transform_0, window_bounds = array<i64: 16, 1>}, {pipeline_mode = #tpu.pipeline_mode<synchronous>, transform_indices = @transform_1, window_bounds = array<i64: 24, 128>}, {pipeline_mode = #tpu.pipeline_mode<synchronous>, transform_indices = @transform_2, window_bounds = array<i64: 24, 128>}, {transform_indices = @transform_3, window_bounds = array<i64: 16, 128>}, {transform_indices = @transform_4, window_bounds = array<i64: 16, 128>}]} {
    %c0 = arith.constant 0 : index
    %c0_0 = arith.constant 0 : index
    %0 = vector.load %arg1[%c0, %c0_0] : memref<16x1xi32, #tpu.memory_space<vmem>>, vector<16x1xi32>
    %1 = tpu.iota {dimensions = array<i32: 1>} : vector<16x24xi32>
    %2 = vector.broadcast %0 : vector<16x1xi32> to vector<16x24xi32>
    %3 = arith.cmpi eq, %2, %1 : vector<16x24xi32>
    %4 = arith.extui %3 : vector<16x24xi1> to vector<16x24xi32>
    %5 = arith.sitofp %4 : vector<16x24xi32> to vector<16x24xf32>
    %c0_1 = arith.constant 0 : index
    %c0_2 = arith.constant 0 : index
    %6 = vector.load %arg2[%c0_1, %c0_2] : memref<24x128xf32, #tpu.memory_space<vmem>>, vector<24x128xf32>
    %cst = arith.constant dense<0.000000e+00> : vector<16x128xf32>
    %7 = tpu.matmul %5, %6, %cst {dimension_numbers = #tpu.dot_dimension_numbers<[1], [0], [0], [1], [0, 0, 1, 1], [], []>} : vector<16x24xf32>, vector<24x128xf32>, vector<16x128xf32> -> vector<16x128xf32>
    %c0_3 = arith.constant 0 : index
    %c0_4 = arith.constant 0 : index
    %8 = vector.load %arg3[%c0_3, %c0_4] : memref<24x128xf32, #tpu.memory_space<vmem>>, vector<24x128xf32>
    %cst_5 = arith.constant 5.000000e-01 : f32
    %9 = vector.broadcast %cst_5 : f32 to vector<24x128xf32>
    %10 = arith.mulf %9, %8 : vector<24x128xf32>
    %11 = math.exp %10 : vector<24x128xf32>
    %cst_6 = arith.constant dense<0.000000e+00> : vector<16x128xf32>
    %12 = tpu.matmul %5, %11, %cst_6 {dimension_numbers = #tpu.dot_dimension_numbers<[1], [0], [0], [1], [0, 0, 1, 1], [], []>} : vector<16x24xf32>, vector<24x128xf32>, vector<16x128xf32> -> vector<16x128xf32>
    %c0_7 = arith.constant 0 : index
    %c0_8 = arith.constant 0 : index
    %13 = vector.load %arg4[%c0_7, %c0_8] : memref<16x128xf32, #tpu.memory_space<vmem>>, vector<16x128xf32>
    %14 = arith.mulf %13, %12 : vector<16x128xf32>
    %15 = arith.addf %7, %14 : vector<16x128xf32>
    %c0_9 = arith.constant 0 : index
    %c0_10 = arith.constant 0 : index
    %16 = vector.load %arg5[%c0_9, %c0_10] : memref<16x128xf32, #tpu.memory_space<vmem>>, vector<16x128xf32>
    tpu.vector_store %arg5[%c0_9, %c0_10], %15 {strides = array<i32>} : memref<16x128xf32, #tpu.memory_space<vmem>>, vector<16x128xf32>,
    return
  }
  func.func @transform_0(%arg0: i32) -> (i32, i32) {
    %c0_i32 = arith.constant 0 : i32
    %c0_i32_0 = arith.constant 0 : i32
    return %arg0, %c0_i32 : i32, i32
  }
  func.func @transform_1(%arg0: i32) -> (i32, i32) {
    %c0_i32 = arith.constant 0 : i32
    %c0_i32_0 = arith.constant 0 : i32
    %c0_i32_1 = arith.constant 0 : i32
    return %c0_i32, %c0_i32_0 : i32, i32
  }
  func.func @transform_2(%arg0: i32) -> (i32, i32) {
    %c0_i32 = arith.constant 0 : i32
    %c0_i32_0 = arith.constant 0 : i32
    %c0_i32_1 = arith.constant 0 : i32
    return %c0_i32, %c0_i32_0 : i32, i32
  }
  func.func @transform_3(%arg0: i32) -> (i32, i32) {
    %c0_i32 = arith.constant 0 : i32
    %c0_i32_0 = arith.constant 0 : i32
    return %arg0, %c0_i32 : i32, i32
  }
  func.func @transform_4(%arg0: i32) -> (i32, i32) {
    %c0_i32 = arith.constant 0 : i32
    %c0_i32_0 = arith.constant 0 : i32
    return %arg0, %c0_i32 : i32, i32
  }
}

</mosaic_0001>

<bundles_post_ra>
// kernel: tpu_custom_call.1
= control target key start
LH: loop header
LB: loop body
LE: loop exit
PB: predicated region body
PF: predicated region fallthrough
CT: control target
= control target key end

     0   :  { %9 = vsyncpa [#allocation3], 0  ;;  %s434_s0 = inlined_call_operand.vmem [shape: s32[16,1], index: 0, kind: input, shape index: {}]   ;;  %s435_s1 = inlined_call_operand.hbm [shape: f32[24,128], index: 1, kind: input, shape index: {}]   ;;  %s436_s2 = inlined_call_operand.hbm [shape: f32[24,128], index: 2, kind: input, shape index: {}]   ;;  %s437_s3 = inlined_call_operand.vmem [shape: f32[16,128], index: 3, kind: input, shape index: {}]   ;;  %s438_s4 = inlined_call_operand.hbm [shape: f32[16,128], index: 4, kind: output, shape index: {}]  }
   0x1   :  { %10 = vsyncpa [#allocation6], 0 }
   0x2   :  { %11 = vsyncpa [#allocation4], 0  ;;  %s372_s15 = smov [#allocation2]  }
   0x3   :  { %s19_s16 = sshll.u32 %s372_s15, 4  ;;  %s20_s16 = int_to_ptr.vmem [resolvable:$true] %s19_s16 }
   0x4   :  { %s314_s17 = scalar_lea.vmem %s20_s16, 384  ;;  %p319_p1 = scmp.lt.s32.totalorder %s20_s16, %s20_s16 }
   0x5   :  { %p315_p0 = scmp.ne.s32.totalorder %s20_s16, %s314_s17  ;;  %p320_p2 = scmp.lt.s32.totalorder %s314_s17, %s314_s17 }
   0x7   :  { %p321_p3 = por %p320_p2, %p319_p1 }
   0x9   :  { %p322_p4 = pnand %p321_p3, %p315_p0 }
   0xb   :  { %325 = shalt.err (!%p322_p4)
}
   0xc   :  { %s373_s18 = smov 128   ;;  %s374_s19 = smov 8  }
   0xd   :  { %25 = dma.hbm_to_vmem [thread:$0]  %s435_s1, 384, %s20_s16, [#allocation3], %s373_s18, %s373_s18, %s374_s19  }
   0xe   :  { %s375_s22 = smov [#allocation5]  }
   0xf   :  { %s31_s23 = sshll.u32 %s375_s22, 4  ;;  %s32_s23 = int_to_ptr.vmem [resolvable:$true] %s31_s23 }
  0x10   :  { %s334_s24 = scalar_lea.vmem %s32_s23, 384  ;;  %p339_p6 = scmp.lt.s32.totalorder %s32_s23, %s32_s23 }
  0x11   :  { %p335_p5 = scmp.ne.s32.totalorder %s32_s23, %s334_s24  ;;  %p340_p7 = scmp.lt.s32.totalorder %s334_s24, %s334_s24 }
  0x13   :  { %p341_p8 = por %p340_p7, %p339_p6 }
  0x15   :  { %p342_p9 = pnand %p341_p8, %p335_p5 }
  0x17   :  { %345 = shalt.err (!%p342_p9)
}
  0x18   :  { %37 = dma.hbm_to_vmem [thread:$0]  %s436_s2, 384, %s32_s23, [#allocation6], %s373_s18, %s373_s18, %s374_s19  }
  0x19   :  { %366 = dma.done.wait [#allocation3], 384  }
  0x1a   :  { %367 = vsyncadd [#allocation3], 4294966912 }
  0x1b   :  { %368 = dma.done.wait [#allocation6], 384  }
  0x1c   :  { %369 = vsyncadd [#allocation6], 4294966912  ;;  %v376_v0 = vmov 0   ;;  %v46_v1 = vld [vmem:[%s434_s0] sm:$0xff]  ;;  %v67_v2 = vld [vmem:[#allocation5 + $0x10] sm:$0xff]  ;;  %v48_v18 = vlaneseq  ;;  %vm77_vm0 = vcmask 195584  }
  0x1d   :  { %299 = vset.pattern.permute.xlu0 %v376_v0  ;;  %v70_v3 = vmul.f32 0.5, %v67_v2  ;;  %v64_v4 = vld [vmem:[#allocation2 + $0x10] sm:$0xff]  ;;  %v66_v5 = vld [vmem:[#allocation5 + $0x8] sm:$0xff]  ;;  %v63_v6 = vld [vmem:[#allocation2 + $0x8] sm:$0xff]  ;;  %v377_v21 = vmov 0.0   ;;  %s378_s6 = smov [#allocation7]  }
  0x1e   :  { %51 = vperm.xlu0 %299, %v46_v1   ;;  %v47_v7 = vld [vmem:[%s434_s0 + $0x8] sm:$0xff]  ;;  %283 = vmatprep.subr.mxu1 %v64_v4  ;;  %v69_v8 = vmul.f32 0.5, %v66_v5  ;;  %v65_v9 = vld [vmem:[#allocation5] sm:$0xff]  ;;  %v62_v12 = vld [vmem:[#allocation2] sm:$0xff]  ;;  %v49_v19 = vand.u32 127, %v48_v18  ;;  %s245_s7 = sshll.u32 %s378_s6, 4  ;;  %s246_s7 = int_to_ptr.vmem [resolvable:$true] %s245_s7 }
  0x1f   :  { %v75_v10 = vmul.f32 1.442695, %v70_v3  ;;  %284 = vmatpush3.msra.mxu1 %v64_v4  ;;  %v68_v11 = vmul.f32 0.5, %v65_v9  ;;  %v160_v25 = vld [vmem:[%s437_s3 + $0x8] sm:$0xff]  ;;  %v159_v28 = vld [vmem:[%s437_s3] sm:$0xff]  ;;  %s346_s8 = scalar_lea.vmem %s246_s7, 256  ;;  %p351_p11 = scmp.lt.s32.totalorder %s246_s7, %s246_s7 }
  0x20   :  { %v73_v13 = vmul.f32 1.442695, %v69_v8  ;;  %285 = vmatprep.subr.mxu1 %v63_v6  ;;  %p347_p10 = scmp.ne.s32.totalorder %s246_s7, %s346_s8  ;;  %p352_p12 = scmp.lt.s32.totalorder %s346_s8, %s346_s8 }
  0x21   :  { %300 = vpow2.f32 %v75_v10  ;;  %286 = vmatpush3.msra.mxu1 %v63_v6  ;;  %v71_v14 = vmul.f32 1.442695, %v68_v11 }
  0x22   :  { %54 = vperm.xlu0 %299, %v47_v7   ;;  %302 = vpow2.f32 %v73_v13  ;;  %287 = vmatprep.subr.mxu1 %v62_v12  ;;  %p353_p13 = por %p352_p12, %p351_p11 }
  0x23   :  { %304 = vpow2.f32 %v71_v14  ;;  %288 = vmatpush3.msra.mxu1 %v62_v12 }
  0x24   :  { %p354_p0 = pnand %p353_p13, %p347_p10 }
  0x2e   :  { %v301_v15 = vpop.eup %300 }
  0x2f   :  { %v303_v16 = vpop.eup %302  ;;  %274 = vmatprep.subr.mxu0 %v301_v15 }
  0x30   :  { %v305_v17 = vpop.eup %304  ;;  %275 = vmatpush3.msra.mxu0 %v301_v15 }
  0x31   :  { %276 = vmatprep.subr.mxu0 %v303_v16 }
  0x32   :  { %277 = vmatpush3.msra.mxu0 %v303_v16 }
  0x33   :  { %278 = vmatprep.subr.mxu0 %v305_v17 }
  0x34   :  { %279 = vmatpush3.msra.mxu0 %v305_v17 }
  0x99   :  { %v52_v20 = vpop.permute.xlu0 %51 }
  0x9a   :  { %vm56_vm1 = vcmp.eq.s32.totalorder %v52_v20, %v49_v19 }
  0x9b   :  { %v258_v22 = vsel %vm56_vm1, 1.0, %v377_v21 }
  0x9c   :  { %280 = vmatprep.mubr.msk.f32.mxu0 %vm77_vm0, %v258_v22  ;;  %289 = vmatprep.mubr.msk.f32.mxu1 %vm77_vm0, %v258_v22 }
  0x9d   :  { %v55_v23 = vpop.permute.xlu0 %54 }
  0x9e   :  { %vm57_vm2 = vcmp.eq.s32.totalorder %v55_v23, %v49_v19 }
  0x9f   :  { %v259_v24 = vsel %vm57_vm2, 1.0, %v377_v21 }
  0xa0   :  { %281 = vmatmul.mubr.msk.f32.vlgmr.msra.gmra.mxu0 %vm77_vm0, %v259_v24  ;;  %290 = vmatmul.mubr.msk.f32.vlgmr.msra.gmra.mxu1 %vm77_vm0, %v259_v24 }
 0x160   :  { %v282_v26 = vpop.f32.mrf.mxu0  ;;  %v291_v27 = vpop.f32.mrf.mxu1 }
 0x161   :  { %v162_v29 = vmul.f32 %v282_v26, %v160_v25 }
 0x162   :  { %v150_v30 = vpop.f32.mrf.mxu0  ;;  %v229_v33 = vpop.f32.mrf.mxu1 }
 0x163   :  { %v235_v31 = vadd.f32 %v291_v27, %v162_v29  ;;  %v161_v32 = vmul.f32 %v159_v28, %v150_v30 }
 0x165   :  { %239 = vst [vmem:[#allocation7 + $0x8] sm:$0xff] %v235_v31  ;;  %v230_v34 = vadd.f32 %v229_v33, %v161_v32 }
 0x167   :  { %238 = vst [vmem:[#allocation7] sm:$0xff] %v230_v34 }
 0x168   :  { %357 = shalt.err (!%p354_p0)
}
 0x169   :  { %251 = dma.vmem_to_hbm [thread:$0]  %s246_s7, 256, %s438_s4, [#allocation4], %s373_s18, %s373_s18, %s374_s19  }
 0x16a   :  { %370 = dma.done.wait [#allocation4], 256  }
 0x16b   :  { %371 = vsyncadd [#allocation4], 4294967040 }
 0x16c   :  { %255 = vsyncpa [#allocation3], 1 }
 0x16d   :  { %256 = vsyncpa [#allocation6], 1 }
 0x16e   :  { %257 = vsyncpa [#allocation4], 1 }

</bundles_post_ra>
